<compile_context>
chip_gen: v6e
topology: v6e:2x2x1
jax: 0.10.0
libtpu: 0.0.40
codegen_flags: <defaults>
</compile_context>

<pallas_src>
import jax
import jax.numpy as jnp
import numpy as np
from jax.experimental import pallas as pl
from jax.experimental.pallas import tpu as pltpu

N_CH1 = 40      # n_ch1 in the PyTorch module
K_TIME = 25     # temporal conv kernel width
POOL_K = 75     # avg-pool kernel (time)
POOL_S = 15     # avg-pool stride
PAD_R = 3       # ZeroPad2d((0, 3, 0, 0)) right pad on time
BN_EPS = 1e-5

VMEM_BUDGET_BYTES = 12 * 1024 * 1024   # conservative: fits every generation's scoped limit
VMEM_LIMIT_BYTES = 32 * 1024 * 1024    # explicit scoped-VMEM limit (<= physical on all chips)


# --------------------------------------------------------------------------- kernel
def shallow_conv_kernel(col_ref, w_ref, pool_ref, o_ref):
    # col_ref:  (1, K*C+1, bb*L)   im2col slab (last row is ones -> bias fold)
    # w_ref:    (40, K*C+1)        conv1*conv2*BN fused weights (+ bias column)
    # pool_ref: (bb*L, bb*n_out)   block-diagonal 1/75 pooling matrix
    # o_ref:    (1, 40, bb*n_out)  log(avg_pool(square(.))), lane-dense slab
    y = jnp.dot(w_ref[...], col_ref[0],
                preferred_element_type=jnp.float32)           # (40, bb*L)  MXU
    sq = y * y                                                # VPU
    pooled = jnp.dot(sq, pool_ref[...],
                     preferred_element_type=jnp.float32)      # (40, bb*n_out) MXU
    # TODO(synk): F.dropout(x) defaults to training=True (stochastic p=0.5); applied as identity.
    o_ref[0] = jnp.log(pooled)                                # EUP


# --------------------------------------------------------------------------- helpers
def _tpu_core_count():
    """Best-effort TensorCores-per-device; falls back to 1 (v5e/v6e behavior)."""
    try:
        info = pltpu.get_tpu_info()
        for attr in ("num_cores", "core_count", "num_tensorcores", "tensorcore_count"):
            v = getattr(info, attr, None)
            if isinstance(v, int) and v > 0:
                return v
    except Exception:
        pass
    try:
        v = getattr(jax.devices()[0], "num_cores", None)
        if isinstance(v, int) and v > 0:
            return v
    except Exception:
        pass
    return 1


def _pick_batch_block(B, L, kp, n_out, n_cores):
    """Largest batch block (divisor of B) fitting the VMEM budget; split only on multi-TC parts."""
    def footprint(bb):
        cols = 2 * kp * (bb * L) * 4                 # double-buffered input slab
        pool = 2 * (bb * L) * (bb * n_out) * 4       # pooling matrix (constant block)
        w = 2 * N_CH1 * kp * 4
        outb = 2 * N_CH1 * (bb * n_out) * 4
        return cols + pool + w + outb

    divisors = [d for d in range(1, B + 1) if B % d == 0]
    fitting = [d for d in divisors if footprint(d) <= VMEM_BUDGET_BYTES]
    if not fitting:
        return 1
    bb = fitting[-1]                                 # single fat step on 1-TC chips
    if n_cores > 1:
        # Prefer >= n_cores "parallel" grid points while keeping matmul N >= ~512 lanes.
        for d in reversed(fitting):
            if B // d >= n_cores and d * L >= 512:
                return d
        for d in reversed(fitting):
            if B // d >= n_cores:
                return d
    return bb


# --------------------------------------------------------------------------- wrapper
def shallow_conv_net_forward(x, params):
    """x: (B, 1, C, T) float32 (NCHW, like the PyTorch module). Returns (B, 40 * n_out_time)."""
    w1, b1, w2, gamma, beta, rmean, rvar = params
    B, _, C, T = x.shape
    L = T + PAD_R - K_TIME + 1
    n_out = (L - POOL_K) // POOL_S + 1
    assert n_out >= 1, "input_time too small for the 75-wide avg pool"
    kp = K_TIME * C + 1                                   # + ones row for the fused bias

    # ---- fold conv1 -> conv2 -> eval-BN into one weight, bias folded as an extra column ----
    scale = gamma / jnp.sqrt(rvar + BN_EPS)                                # (40,)
    wf = jnp.einsum('oic,ij->ojc', w2, w1).reshape(N_CH1, K_TIME * C)      # rows = j*C + c
    bias_fused = w2.sum(axis=2) @ b1                                       # (40,)
    w_k = scale[:, None] * wf                                              # (40, K*C)
    b_k = scale * bias_fused + beta - rmean * scale                        # (40,)
    w_aug = jnp.concatenate([w_k, b_k[:, None]], axis=1).astype(jnp.float32)  # (40, kp)

    # ---- batch blocking (chip-aware) ----
    n_cores = _tpu_core_count()
    bb = _pick_batch_block(B, L, kp, n_out, n_cores)
    n_blocks = B // bb

    # ---- im2col in the XLA wrapper (keeps lane-shifted/masked stores off the kernel) ----
    xs = x[:, 0]                                                           # (B, C, T)
    xp = jnp.pad(xs, ((0, 0), (0, 0), (0, PAD_R)))                         # right zero-pad
    cols = jnp.stack([xp[:, :, j:j + L] for j in range(K_TIME)], axis=1)   # (B, 25, C, L)
    cols = cols.reshape(B, K_TIME * C, L)
    cols = jnp.concatenate([cols, jnp.ones((B, 1, L), jnp.float32)], axis=1)   # (B, kp, L)
    # (n_blocks, kp, bb*L): column index = b*L + l  -> fat lane-dense matmul N per step
    cols_blk = (cols.reshape(n_blocks, bb, kp, L)
                    .transpose(0, 2, 1, 3)
                    .reshape(n_blocks, kp, bb * L)).astype(jnp.float32)

    # ---- block-diagonal pooling matrix: avg_pool((1,75),15) over the whole block in 1 matmul ----
    l_idx = jnp.arange(L)[:, None]
    p_idx = jnp.arange(n_out)[None, :]
    pool_small = (((l_idx >= p_idx * POOL_S) & (l_idx < p_idx * POOL_S + POOL_K))
                  .astype(jnp.float32) / POOL_K)                           # (L, n_out)
    pool_blk = jnp.kron(jnp.eye(bb, dtype=jnp.float32), pool_small)        # (bb*L, bb*n_out)

    out = pl.pallas_call(
        shallow_conv_kernel,
        out_shape=jax.ShapeDtypeStruct((n_blocks, N_CH1, bb * n_out), jnp.float32),
        grid=(n_blocks,),
        in_specs=[
            pl.BlockSpec((1, kp, bb * L), lambda g: (g, 0, 0)),
            pl.BlockSpec((N_CH1, kp), lambda g: (0, 0)),
            pl.BlockSpec((bb * L, bb * n_out), lambda g: (0, 0)),
        ],
        out_specs=pl.BlockSpec((1, N_CH1, bb * n_out), lambda g: (g, 0, 0)),
        compiler_params=pltpu.CompilerParams(
            dimension_semantics=("parallel",),
            vmem_limit_bytes=VMEM_LIMIT_BYTES,
        ),
    )(cols_blk, w_aug, pool_blk)

    # layout plumbing back to PyTorch's reshape(B, -1) of (B, 40, 1, n_out)
    out = out.reshape(n_blocks, N_CH1, bb, n_out).transpose(0, 2, 1, 3)
    return out.reshape(B, N_CH1 * n_out)


# --------------------------------------------------------------------------- reference
def reference_forward(x, params):
    """Pure-JAX reference mirroring the PyTorch forward (eval BN, identity dropout)."""
    w1, b1, w2, gamma, beta, rmean, rvar = params
    B, _, C, T = x.shape
    hp = jax.lax.Precision.HIGHEST
    xp = jnp.pad(x[:, 0], ((0, 0), (0, 0), (0, PAD_R)))                     # (B, C, T+3)
    L = T + PAD_R - K_TIME + 1
    cols = jnp.stack([xp[..., j:j + L] for j in range(K_TIME)], axis=-2)    # (B, C, 25, L)
    out1 = jnp.einsum('kj,bcjl->bkcl', w1, cols, precision=hp) + b1[None, :, None, None]
    out2 = jnp.einsum('oic,bicl->bol', w2, out1, precision=hp)              # (B, 40, L)
    scale = gamma / jnp.sqrt(rvar + BN_EPS)
    y = (out2 - rmean[None, :, None]) * scale[None, :, None] + beta[None, :, None]
    sq = y * y
    n_out = (L - POOL_K) // POOL_S + 1
    pooled = jnp.stack(
        [sq[..., p * POOL_S:p * POOL_S + POOL_K].mean(-1) for p in range(n_out)], axis=-1)
    return jnp.log(pooled).reshape(B, -1)


if __name__ == "__main__":
    key = jax.random.PRNGKey(0)
    B, input_ch, input_time = 2, 4, 126
    ks = jax.random.split(key, 8)

    x = jax.random.normal(ks[0], (B, 1, input_ch, input_time), jnp.float32)

    # deterministic synthetic parameters (shapes follow the PyTorch __init__)
    w1 = 0.1 * jax.random.normal(ks[1], (N_CH1, K_TIME), jnp.float32)           # Conv2d(1,40,(1,25)).weight
    b1 = 0.1 * jax.random.normal(ks[2], (N_CH1,), jnp.float32)                  # Conv2d(1,40,(1,25)).bias
    w2 = 0.1 * jax.random.normal(ks[3], (N_CH1, N_CH1, input_ch), jnp.float32)  # Conv2d(40,40,(C,1)).weight
    gamma = 1.0 + 0.1 * jax.random.normal(ks[4], (N_CH1,), jnp.float32)         # BN weight
    beta = 0.1 * jax.random.normal(ks[5], (N_CH1,), jnp.float32)                # BN bias
    rmean = 0.1 * jax.random.normal(ks[6], (N_CH1,), jnp.float32)               # BN running_mean
    rvar = 1.0 + 0.5 * jax.random.uniform(ks[7], (N_CH1,), jnp.float32)         # BN running_var
    params = (w1, b1, w2, gamma, beta, rmean, rvar)

    out = shallow_conv_net_forward(x, params)
    out = jax.block_until_ready(out)

    ref = reference_forward(x, params)
    # Tolerance allows for reduced-precision MXU passes on f32 matmuls inside the kernel
    # (log amplifies matmul rounding into absolute error).
    np.testing.assert_allclose(np.asarray(out), np.asarray(ref), rtol=1e-2, atol=1e-2)
    print("KERNEL_OK")
</pallas_src>

<mosaic_0001>
module attributes {stable_mosaic.version = 11 : i64} {
  func.func @shallow_conv_kernel(%arg0: i32, %arg1: memref<1x101x210xf32, #tpu.memory_space<vmem>>, %arg2: memref<40x101xf32, #tpu.memory_space<vmem>>, %arg3: memref<210x6xf32, #tpu.memory_space<vmem>>, %arg4: memref<1x40x6xf32, #tpu.memory_space<vmem>>) attributes {dimension_semantics = [#tpu.dimension_semantics<parallel>], iteration_bounds = array<i64: 1>, scalar_prefetch = 0 : i64, scratch_operands = 0 : i64, tpu.core_type = #tpu.core_type<tc>, window_params = [{transform_indices = @transform_0, window_bounds = array<i64: 1, 101, 210>}, {pipeline_mode = #tpu.pipeline_mode<synchronous>, transform_indices = @transform_1, window_bounds = array<i64: 40, 101>}, {pipeline_mode = #tpu.pipeline_mode<synchronous>, transform_indices = @transform_2, window_bounds = array<i64: 210, 6>}, {transform_indices = @transform_3, window_bounds = array<i64: 1, 40, 6>}]} {
    %c0 = arith.constant 0 : index
    %c0_0 = arith.constant 0 : index
    %0 = vector.load %arg2[%c0, %c0_0] : memref<40x101xf32, #tpu.memory_space<vmem>>, vector<40x101xf32>
    %c0_1 = arith.constant 0 : index
    %c0_2 = arith.constant 0 : index
    %c0_3 = arith.constant 0 : index
    %1 = vector.load %arg1[%c0_1, %c0_2, %c0_3] : memref<1x101x210xf32, #tpu.memory_space<vmem>>, vector<1x101x210xf32>
    %2 = vector.shape_cast %1 : vector<1x101x210xf32> to vector<101x210xf32>
    %cst = arith.constant dense<0.000000e+00> : vector<40x210xf32>
    %3 = tpu.matmul %0, %2, %cst {dimension_numbers = #tpu.dot_dimension_numbers<[1], [0], [0], [1], [0, 0, 1, 1], [], []>} : vector<40x101xf32>, vector<101x210xf32>, vector<40x210xf32> -> vector<40x210xf32>
    %4 = arith.mulf %3, %3 : vector<40x210xf32>
    %c0_4 = arith.constant 0 : index
    %c0_5 = arith.constant 0 : index
    %5 = vector.load %arg3[%c0_4, %c0_5] : memref<210x6xf32, #tpu.memory_space<vmem>>, vector<210x6xf32>
    %cst_6 = arith.constant dense<0.000000e+00> : vector<40x6xf32>
    %6 = tpu.matmul %4, %5, %cst_6 {dimension_numbers = #tpu.dot_dimension_numbers<[1], [0], [0], [1], [0, 0, 1, 1], [], []>} : vector<40x210xf32>, vector<210x6xf32>, vector<40x6xf32> -> vector<40x6xf32>
    %7 = math.log %6 : vector<40x6xf32>
    %c0_7 = arith.constant 0 : index
    %c0_8 = arith.constant 0 : index
    %c0_9 = arith.constant 0 : index
    %8 = vector.load %arg4[%c0_7, %c0_8, %c0_9] : memref<1x40x6xf32, #tpu.memory_space<vmem>>, vector<1x40x6xf32>
    %9 = vector.shape_cast %8 : vector<1x40x6xf32> to vector<40x6xf32>
    %10 = vector.shape_cast %7 : vector<40x6xf32> to vector<1x40x6xf32>
    tpu.vector_store %arg4[%c0_7, %c0_8, %c0_9], %10 {strides = array<i32>} : memref<1x40x6xf32, #tpu.memory_space<vmem>>, vector<1x40x6xf32>,
    return
  }
  func.func @transform_0(%arg0: i32) -> (i32, i32, i32) {
    %c0_i32 = arith.constant 0 : i32
    %c0_i32_0 = arith.constant 0 : i32
    %c0_i32_1 = arith.constant 0 : i32
    return %arg0, %c0_i32, %c0_i32_0 : i32, i32, i32
  }
  func.func @transform_1(%arg0: i32) -> (i32, i32) {
    %c0_i32 = arith.constant 0 : i32
    %c0_i32_0 = arith.constant 0 : i32
    %c0_i32_1 = arith.constant 0 : i32
    return %c0_i32, %c0_i32_0 : i32, i32
  }
  func.func @transform_2(%arg0: i32) -> (i32, i32) {
    %c0_i32 = arith.constant 0 : i32
    %c0_i32_0 = arith.constant 0 : i32
    %c0_i32_1 = arith.constant 0 : i32
    return %c0_i32, %c0_i32_0 : i32, i32
  }
  func.func @transform_3(%arg0: i32) -> (i32, i32, i32) {
    %c0_i32 = arith.constant 0 : i32
    %c0_i32_0 = arith.constant 0 : i32
    %c0_i32_1 = arith.constant 0 : i32
    return %arg0, %c0_i32, %c0_i32_0 : i32, i32, i32
  }
}

</mosaic_0001>

<bundles_post_ra>
// kernel: tpu_custom_call.1
= control target key start
LH: loop header
LB: loop body
LE: loop exit
PB: predicated region body
PF: predicated region fallthrough
CT: control target
= control target key end

     0   :  { %vm61_vm0 = vcmask 1044480   ;;  %v354_v3 = vmov 0.0   ;;  %vm45_vm1 = vcmask 826368   ;;  %vm216_vm2 = vcmask 1041408   ;;  %s611_s0 = inlined_call_operand.vmem [shape: f32[1,101,210], index: 0, kind: input, shape index: {}]   ;;  %s612_s2 = inlined_call_operand.vmem [shape: f32[210,6], index: 2, kind: input, shape index: {}]   ;;  %s613_s1 = inlined_call_operand.vmem [shape: f32[40,101], index: 1, kind: input, shape index: {}]   ;;  %s614_s3 = inlined_call_operand.vmem [shape: f32[1,40,6], index: 3, kind: output, shape index: {}]  }
   0x1   :  { %v44_v0 = vld [vmem:[%s611_s0 + $0xc8] sm:$0x1f]  ;;  %v43_v1 = vld [vmem:[%s611_s0 + $0xc0] sm:$0x1f]  ;;  %v42_v2 = vld [vmem:[%s611_s0 + $0xb8] sm:$0xff]  ;;  %132 = vmatprep.mubr.f32.mxu0 %v354_v3  ;;  %220 = vmatprep.subr.mxu1 %v354_v3  ;;  %vm200_vm3 = vcmask 670720  }
   0x2   :  { %330 = vmatprep.subr.msk.mxu0 %vm61_vm0, %v44_v0  ;;  %v41_v4 = vld [vmem:[%s611_s0 + $0xb0] sm:$0xff]  ;;  %v40_v5 = vld [vmem:[%s611_s0 + $0xa8] sm:$0xff]  ;;  %v39_v6 = vld [vmem:[%s611_s0 + $0xa0] sm:$0xff]  ;;  %vm320_vm4 = vcmask 48128  }
   0x3   :  { %331 = vmatpush1.msk.msra.mxu0 %vm61_vm0, %v43_v1  ;;  %v38_v7 = vld [vmem:[%s611_s0 + $0x98] sm:$0xff]  ;;  %v37_v8 = vld [vmem:[%s611_s0 + $0x90] sm:$0xff]  ;;  %v36_v9 = vld [vmem:[%s611_s0 + $0x88] sm:$0xff] }
   0x4   :  { %76 = vmatprep.subr.mxu0 %v42_v2  ;;  %v35_v10 = vld [vmem:[%s611_s0 + $0x80] sm:$0xff]  ;;  %v34_v11 = vld [vmem:[%s611_s0 + $0x78] sm:$0xff]  ;;  %v33_v12 = vld [vmem:[%s611_s0 + $0x70] sm:$0xff] }
   0x5   :  { %77 = vmatpush1.msra.mxu0 %v41_v4  ;;  %v32_v13 = vld [vmem:[%s611_s0 + $0x68] sm:$0xff]  ;;  %v188_v14 = vld [vmem:[%s612_s2 + $0x78] sm:$0xff]  ;;  %v187_v15 = vld [vmem:[%s612_s2 + $0x70] sm:$0xff] }
   0x6   :  { %78 = vmatprep.subr.mxu0 %v40_v5  ;;  %v31_v16 = vld [vmem:[%s611_s0 + $0x60] sm:$0xff]  ;;  %221 = vmatpush1.msra.mxu1 %v188_v14  ;;  %v30_v17 = vld [vmem:[%s611_s0 + $0x58] sm:$0xff]  ;;  %v186_v18 = vld [vmem:[%s612_s2 + $0x68] sm:$0xff] }
   0x7   :  { %79 = vmatpush1.msra.mxu0 %v39_v6  ;;  %222 = vmatprep.subr.mxu1 %v354_v3  ;;  %v29_v19 = vld [vmem:[%s611_s0 + $0x50] sm:$0xff]  ;;  %v28_v20 = vld [vmem:[%s611_s0 + $0x48] sm:$0xff]  ;;  %v185_v21 = vld [vmem:[%s612_s2 + $0x60] sm:$0xff] }
   0x8   :  { %80 = vmatprep.subr.mxu0 %v38_v7  ;;  %223 = vmatpush1.msra.mxu1 %v187_v15  ;;  %v27_v22 = vld [vmem:[%s611_s0 + $0x40] sm:$0xff]  ;;  %v26_v23 = vld [vmem:[%s611_s0 + $0x38] sm:$0xff]  ;;  %v25_v25 = vld [vmem:[%s611_s0 + $0x30] sm:$0xff] }
   0x9   :  { %81 = vmatpush1.msra.mxu0 %v37_v8  ;;  %224 = vmatprep.subr.mxu1 %v354_v3  ;;  %v184_v24 = vld [vmem:[%s612_s2 + $0x58] sm:$0xff]  ;;  %v24_v26 = vld [vmem:[%s611_s0 + $0x28] sm:$0xff]  ;;  %v183_v27 = vld [vmem:[%s612_s2 + $0x50] sm:$0xff] }
   0xa   :  { %82 = vmatprep.subr.mxu0 %v36_v9  ;;  %225 = vmatpush1.msra.mxu1 %v186_v18  ;;  %v23_v28 = vld [vmem:[%s611_s0 + $0x20] sm:$0xff]  ;;  %v22_v29 = vld [vmem:[%s611_s0 + $0x18] sm:$0xff]  ;;  %v182_v30 = vld [vmem:[%s612_s2 + $0x48] sm:$0xff] }
   0xb   :  { %83 = vmatpush1.msra.mxu0 %v35_v10  ;;  %226 = vmatprep.subr.mxu1 %v354_v3  ;;  %v21_v31 = vld [vmem:[%s611_s0 + $0x10] sm:$0xff]  ;;  %v20_v32 = vld [vmem:[%s611_s0 + $0x8] sm:$0xff]  ;;  %v181_v33 = vld [vmem:[%s612_s2 + $0x40] sm:$0xff] }
   0xc   :  { %84 = vmatprep.subr.mxu0 %v34_v11  ;;  %227 = vmatpush1.msra.mxu1 %v185_v21  ;;  %v19_v34 = vld [vmem:[%s611_s0] sm:$0xff]  ;;  %v180_v36 = vld [vmem:[%s612_s2 + $0x38] sm:$0xff]  ;;  %v179_v37 = vld [vmem:[%s612_s2 + $0x30] sm:$0xff] }
   0xd   :  { %85 = vmatpush1.msra.mxu0 %v33_v12  ;;  %228 = vmatprep.subr.mxu1 %v354_v3  ;;  %v14_v35 = vld [vmem:[%s613_s1] sm:$0xff]  ;;  %v15_v38 = vld [vmem:[%s613_s1 + $0x8] sm:$0xff]  ;;  %v16_v41 = vld [vmem:[%s613_s1 + $0x10] sm:$0xff] }
   0xe   :  { %86 = vmatprep.subr.mxu0 %v32_v13  ;;  %229 = vmatpush1.msra.mxu1 %v184_v24  ;;  %v178_v39 = vld [vmem:[%s612_s2 + $0x28] sm:$0xff]  ;;  %v177_v40 = vld [vmem:[%s612_s2 + $0x20] sm:$0xff]  ;;  %v176_v42 = vld [vmem:[%s612_s2 + $0x18] sm:$0xff] }
   0xf   :  { %87 = vmatpush1.msra.mxu0 %v31_v16  ;;  %230 = vmatprep.subr.mxu1 %v354_v3  ;;  %v175_v43 = vld [vmem:[%s612_s2 + $0x10] sm:$0xff]  ;;  %v17_v44 = vld [vmem:[%s613_s1 + $0x18] sm:$0xff]  ;;  %v174_v45 = vld [vmem:[%s612_s2 + $0x8] sm:$0xff] }
  0x10   :  { %88 = vmatprep.subr.mxu0 %v30_v17  ;;  %231 = vmatpush1.msra.mxu1 %v183_v27  ;;  %v173_v46 = vld [vmem:[%s612_s2] sm:$0xff]  ;;  %v199_v48 = vld [vmem:[%s612_s2 + $0xd0] sm:$0x3]  ;;  %v198_v49 = vld [vmem:[%s612_s2 + $0xc8] sm:$0xff] }
  0x11   :  { %89 = vmatpush1.msra.mxu0 %v29_v19  ;;  %232 = vmatprep.subr.mxu1 %v354_v3  ;;  %v18_v47 = vld [vmem:[%s613_s1 + $0x20] sm:$0xff]  ;;  %v196_v51 = vld [vmem:[%s612_s2 + $0xb8] sm:$0xff]  ;;  %v195_v52 = vld [vmem:[%s612_s2 + $0xb0] sm:$0xff] }
  0x12   :  { %90 = vmatprep.subr.mxu0 %v28_v20  ;;  %233 = vmatpush1.msra.mxu1 %v182_v30  ;;  %v197_v50 = vld [vmem:[%s612_s2 + $0xc0] sm:$0xff]  ;;  %v194_v53 = vld [vmem:[%s612_s2 + $0xa8] sm:$0xff]  ;;  %v192_v55 = vld [vmem:[%s612_s2 + $0x98] sm:$0xff] }
  0x13   :  { %91 = vmatpush1.msra.mxu0 %v27_v22  ;;  %234 = vmatprep.subr.mxu1 %v354_v3  ;;  %v193_v54 = vld [vmem:[%s612_s2 + $0xa0] sm:$0xff]  ;;  %v191_v56 = vld [vmem:[%s612_s2 + $0x90] sm:$0xff]  ;;  %v190_v57 = vld [vmem:[%s612_s2 + $0x88] sm:$0xff] }
  0x14   :  { %92 = vmatprep.subr.mxu0 %v26_v23  ;;  %235 = vmatpush1.msra.mxu1 %v181_v33  ;;  %v189_v58 = vld [vmem:[%s612_s2 + $0x80] sm:$0xff] }
  0x15   :  { %93 = vmatpush1.msra.mxu0 %v25_v25  ;;  %236 = vmatprep.subr.mxu1 %v354_v3 }
  0x16   :  { %94 = vmatprep.subr.mxu0 %v24_v26  ;;  %237 = vmatpush1.msra.mxu1 %v180_v36 }
  0x17   :  { %95 = vmatpush1.msra.mxu0 %v23_v28  ;;  %238 = vmatprep.subr.mxu1 %v354_v3 }
  0x18   :  { %96 = vmatprep.subr.mxu0 %v22_v29  ;;  %239 = vmatpush1.msra.mxu1 %v179_v37 }
  0x19   :  { %97 = vmatpush1.msra.mxu0 %v21_v31  ;;  %240 = vmatprep.subr.mxu1 %v354_v3 }
  0x1a   :  { %98 = vmatprep.subr.mxu0 %v20_v32  ;;  %241 = vmatpush1.msra.mxu1 %v178_v39 }
  0x1b   :  { %99 = vmatpush1.msra.mxu0 %v19_v34  ;;  %242 = vmatprep.subr.mxu1 %v354_v3 }
  0x1c   :  { %332 = vmatmul.mubr.msk.f32.vlgmr.msra.gmra.mxu0 %vm45_vm1, %v14_v35  ;;  %243 = vmatpush1.msra.mxu1 %v177_v40 }
  0x1d   :  { %138 = vmatprep.mubr.f32.mxu0 %v354_v3  ;;  %244 = vmatprep.subr.mxu1 %v354_v3 }
  0x1e   :  { %245 = vmatpush1.msra.mxu1 %v176_v42 }
  0x1f   :  { %246 = vmatprep.subr.mxu1 %v354_v3 }
  0x20   :  { %333 = vmatmul.mubr.msk.f32.gmra.mxu0 %vm45_vm1, %v15_v38  ;;  %247 = vmatpush1.msra.mxu1 %v175_v43 }
  0x21   :  { %144 = vmatprep.mubr.f32.mxu0 %v354_v3  ;;  %248 = vmatprep.subr.mxu1 %v354_v3 }
  0x22   :  { %249 = vmatpush1.msra.mxu1 %v174_v45 }
  0x23   :  { %250 = vmatprep.subr.mxu1 %v354_v3 }
  0x24   :  { %334 = vmatmul.mubr.msk.f32.gmra.mxu0 %vm45_vm1, %v16_v41  ;;  %251 = vmatpush1.msra.mxu1 %v173_v46 }
  0x25   :  { %150 = vmatprep.mubr.f32.mxu0 %v354_v3  ;;  %262 = vmatprep.subr.mxu1 %v354_v3 }
  0x26   :  { %337 = vmatpush2.msk.msra.mxu1 %vm216_vm2, %v199_v48 }
  0x27   :  { %264 = vmatprep.subr.mxu1 %v354_v3 }
  0x28   :  { %335 = vmatmul.mubr.msk.f32.gmra.mxu0 %vm45_vm1, %v17_v44  ;;  %265 = vmatpush2.msra.mxu1 %v198_v49 }
  0x29   :  { %156 = vmatprep.mubr.f32.mxu0 %v354_v3  ;;  %266 = vmatprep.subr.mxu1 %v354_v3 }
  0x2a   :  { %267 = vmatpush2.msra.mxu1 %v197_v50 }
  0x2b   :  { %268 = vmatprep.subr.mxu1 %v354_v3 }
  0x2c   :  { %336 = vmatmul.mubr.msk.f32.gmra.mxu0 %vm45_vm1, %v18_v47  ;;  %269 = vmatpush2.msra.mxu1 %v196_v51 }
  0x2d   :  { %270 = vmatprep.subr.mxu1 %v354_v3 }
  0x2e   :  { %271 = vmatpush2.msra.mxu1 %v195_v52 }
  0x2f   :  { %272 = vmatprep.subr.mxu1 %v354_v3 }
  0x30   :  { %273 = vmatpush2.msra.mxu1 %v194_v53 }
  0x31   :  { %274 = vmatprep.subr.mxu1 %v354_v3 }
  0x32   :  { %275 = vmatpush2.msra.mxu1 %v193_v54 }
  0x33   :  { %276 = vmatprep.subr.mxu1 %v354_v3 }
  0x34   :  { %277 = vmatpush2.msra.mxu1 %v192_v55 }
  0x35   :  { %278 = vmatprep.subr.mxu1 %v354_v3 }
  0x36   :  { %279 = vmatpush2.msra.mxu1 %v191_v56 }
  0x37   :  { %280 = vmatprep.subr.mxu1 %v354_v3 }
  0x38   :  { %281 = vmatpush2.msra.mxu1 %v190_v57 }
  0x39   :  { %282 = vmatprep.subr.mxu1 %v354_v3 }
  0x3a   :  { %283 = vmatpush2.msra.mxu1 %v189_v58 }
  0xdc   :  { %v134_v59 = vpop.f32.mrf.mxu0 }
  0xdd   :  { %v163_v62 = vmul.f32 %v134_v59, %v134_v59 }
  0xde   :  { %v136_v60 = vpop.f32.mrf.mxu0 }
  0xdf   :  { %v164_v61 = vmul.f32 %v136_v60, %v136_v60 }
  0xe0   :  { %v140_v63 = vpop.f32.mrf.mxu0 }
  0xe1   :  { %338 = vmatprep.mubr.msk.f32.mxu1 %vm200_vm3, %v164_v61  ;;  %v165_v2 = vmul.f32 %v140_v63, %v140_v63 }
  0xe2   :  { %v142_v0 = vpop.f32.mrf.mxu0  ;;  %285 = vmatmul.mubr.f32.vlgmr.msra.gmra.mxu1 %v163_v62 }
  0xe3   :  { %v166_v1 = vmul.f32 %v142_v0, %v142_v0 }
  0xe4   :  { %v146_v4 = vpop.f32.mrf.mxu0 }
  0xe5   :  { %339 = vmatprep.mubr.msk.f32.mxu1 %vm200_vm3, %v166_v1  ;;  %v167_v6 = vmul.f32 %v146_v4, %v146_v4 }
  0xe6   :  { %v148_v3 = vpop.f32.mrf.mxu0  ;;  %290 = vmatmul.mubr.f32.gmra.mxu1 %v165_v2 }
  0xe7   :  { %v168_v5 = vmul.f32 %v148_v3, %v148_v3 }
  0xe8   :  { %v152_v7 = vpop.f32.mrf.mxu0 }
  0xe9   :  { %340 = vmatprep.mubr.msk.f32.mxu1 %vm200_vm3, %v168_v5  ;;  %v169_v10 = vmul.f32 %v152_v7, %v152_v7 }
  0xea   :  { %v154_v8 = vpop.f32.mrf.mxu0  ;;  %295 = vmatmul.mubr.f32.gmra.mxu1 %v167_v6 }
  0xeb   :  { %v170_v9 = vmul.f32 %v154_v8, %v154_v8 }
  0xec   :  { %v158_v11 = vpop.f32.mrf.mxu0 }
  0xed   :  { %341 = vmatprep.mubr.msk.f32.mxu1 %vm200_vm3, %v170_v9  ;;  %v171_v14 = vmul.f32 %v158_v11, %v158_v11 }
  0xee   :  { %v160_v12 = vpop.f32.mrf.mxu0  ;;  %300 = vmatmul.mubr.f32.gmra.mxu1 %v169_v10 }
  0xef   :  { %v172_v13 = vmul.f32 %v160_v12, %v160_v12 }
  0xf1   :  { %342 = vmatprep.mubr.msk.f32.mxu1 %vm200_vm3, %v172_v13 }
  0xf2   :  { %305 = vmatmul.mubr.f32.gmra.mxu1 %v171_v14 }
 0x1a2   :  { %v286_v15 = vpop.f32.mrf.mxu1 }
 0x1a3   :  { %344 = vlog2.f32 %v286_v15 }
 0x1a4   :  { %v288_v16 = vpop.f32.mrf.mxu1 }
 0x1a6   :  { %v291_v17 = vpop.f32.mrf.mxu1 }
 0x1a7   :  { %346 = vlog2.f32 %v291_v17 }
 0x1a8   :  { %v293_v18 = vpop.f32.mrf.mxu1 }
 0x1aa   :  { %v296_v19 = vpop.f32.mrf.mxu1 }
 0x1ab   :  { %348 = vlog2.f32 %v296_v19 }
 0x1ac   :  { %v298_v20 = vpop.f32.mrf.mxu1 }
 0x1ae   :  { %v301_v21 = vpop.f32.mrf.mxu1 }
 0x1af   :  { %350 = vlog2.f32 %v301_v21 }
 0x1b0   :  { %v345_v22 = vpop.eup %344  ;;  %v303_v23 = vpop.f32.mrf.mxu1 }
 0x1b1   :  { %v311_v24 = vmul.f32 0.6931472, %v345_v22 }
 0x1b2   :  { %v306_v25 = vpop.f32.mrf.mxu1 }
 0x1b3   :  { %321 = vst.msk [vmem:[%s614_s3] sm:$0xff] %vm320_vm4, %v311_v24  ;;  %352 = vlog2.f32 %v306_v25 }
 0x1b4   :  { %v347_v26 = vpop.eup %346  ;;  %v308_v27 = vpop.f32.mrf.mxu1 }
 0x1b5   :  { %v313_v28 = vmul.f32 0.6931472, %v347_v26 }
 0x1b7   :  { %322 = vst.msk [vmem:[%s614_s3 + $0x8] sm:$0xff] %vm320_vm4, %v313_v28 }
 0x1b8   :  { %v349_v29 = vpop.eup %348 }
 0x1b9   :  { %v315_v30 = vmul.f32 0.6931472, %v349_v29 }
 0x1bb   :  { %323 = vst.msk [vmem:[%s614_s3 + $0x10] sm:$0xff] %vm320_vm4, %v315_v30 }
 0x1bc   :  { %v351_v31 = vpop.eup %350 }
 0x1bd   :  { %v317_v32 = vmul.f32 0.6931472, %v351_v31 }
 0x1bf   :  { %324 = vst.msk [vmem:[%s614_s3 + $0x18] sm:$0xff] %vm320_vm4, %v317_v32 }
 0x1c0   :  { %v353_v33 = vpop.eup %352 }
 0x1c1   :  { %v319_v34 = vmul.f32 0.6931472, %v353_v33 }
 0x1c3   :  { %325 = vst.msk [vmem:[%s614_s3 + $0x20] sm:$0xff] %vm320_vm4, %v319_v34 }

</bundles_post_ra>
